<compile_context>
chip_gen: v6e
topology: v6e:2x2x1
jax: 0.10.0
libtpu: 0.0.40
codegen_flags: <defaults>
</compile_context>

<pallas_src>
import functools

import jax
import jax.numpy as jnp
from jax import lax
from jax.experimental import pallas as pl
from jax.experimental.pallas import tpu as pltpu

C_IN = 2
C_MID = 16
C_OUT = 32
KSIZE = 3
_CONV1_K = 8          # conv1 contraction dim, zero-padded from C_IN*KSIZE=6


def _cdiv(a, b):
    return -(-a // b)


def _fused_conv_kernel(x_ref, w1_ref, b1_ref, w2_ref, b2_ref, o_ref,
                       xcol_ref, col2_ref, *, b_tile, L):
    """Fused conv1d(k=3,p=1) -> relu -> conv1d(k=3,p=1) -> relu.

    x_ref   : (2*b_tile, L)    rows = [b0c0, b0c1, b1c0, b1c1, ...]
    w1_ref  : (16, 8)          col = k*2 + c   (cols 6,7 are zero padding)
    b1_ref  : (16, 1)
    w2_ref  : (32, 48)         col = k*16 + c
    b2_ref  : (32, 1)
    o_ref   : (b_tile, 32, L)
    xcol_ref: (8, b_tile*L)    scratch: im2col of x (taps on sublanes)
    col2_ref: (48, b_tile*L)   scratch: im2col of the hidden activations
    """
    BL = b_tile * L
    lane_aligned = (L % 128 == 0)

    # Keep conv1's two K-padding rows zeroed every step (scratch persists
    # across grid steps and across megacore shards).
    xcol_ref[C_IN * KSIZE:_CONV1_K, :] = jnp.zeros(
        (_CONV1_K - C_IN * KSIZE, BL), jnp.float32)

    # ---- halo masks along the flattened (batch-major) lane axis ----------
    lane = lax.broadcasted_iota(jnp.int32, (1, BL), 1)
    pos = (lane & (L - 1)) if (L & (L - 1)) == 0 else (lane % L)
    has_left = pos >= 1            # position l-1 exists within this batch
    has_right = pos <= L - 2       # position l+1 exists within this batch

    # ---- 1. relayout input tile into lane-major xcol center rows ---------
    # (2*b_tile, L) batch-on-sublanes -> (2, b_tile*L) batch-on-lanes.
    n_grp = b_tile // 4

    def _store_center(off, val):
        if lane_aligned:
            off = pl.multiple_of(off, 128)
        xcol_ref[C_IN:2 * C_IN, pl.ds(off, L)] = val

    def _gather_group(g, carry):
        rows = pl.multiple_of(g * 8, 8)
        x8 = x_ref[pl.ds(rows, 8), :]               # 4 batches x 2 channels
        for i in range(4):                          # static micro-unroll
            _store_center(g * (4 * L) + i * L, x8[2 * i:2 * i + 2, :])
        return carry

    if n_grp > 0:
        lax.fori_loop(0, n_grp, _gather_group, 0, unroll=False)
    for b in range(4 * n_grp, b_tile):              # static remainder (< 4)
        xcol_ref[C_IN:2 * C_IN, b * L:(b + 1) * L] = x_ref[2 * b:2 * b + 2, :]

    # ---- 2. shifted input taps (halo handled by roll + mask) -------------
    xc = xcol_ref[C_IN:2 * C_IN, :]                                   # (2, BL)
    xcol_ref[0:C_IN, :] = jnp.where(
        has_left, pltpu.roll(xc, shift=1, axis=1), 0.0)               # x[l-1]
    xcol_ref[2 * C_IN:3 * C_IN, :] = jnp.where(
        has_right, pltpu.roll(xc, shift=BL - 1, axis=1), 0.0)         # x[l+1]

    # ---- 3. conv1 + ReLU: one MXU matmul over the whole tile -------------
    h = jnp.dot(w1_ref[...], xcol_ref[...],
                preferred_element_type=jnp.float32)                   # (16, BL)
    col2_ref[C_MID:2 * C_MID, :] = jnp.maximum(h + b1_ref[...], 0.0)

    # ---- 4. shifted hidden taps -------------------------------------------
    hc = col2_ref[C_MID:2 * C_MID, :]                                 # (16, BL)
    col2_ref[0:C_MID, :] = jnp.where(
        has_left, pltpu.roll(hc, shift=1, axis=1), 0.0)
    col2_ref[2 * C_MID:3 * C_MID, :] = jnp.where(
        has_right, pltpu.roll(hc, shift=BL - 1, axis=1), 0.0)

    # ---- 5. conv2 + ReLU: chunked matmuls, stored straight into o_ref ----
    w2 = w2_ref[...]
    cb = 8 if b_tile >= 8 else b_tile               # batches per matmul
    b2_bc = jnp.broadcast_to(b2_ref[...], (C_OUT, cb * L))   # hoisted
    n_chunk = b_tile // cb

    def _conv2_chunk(ci, carry):
        lane0 = ci * (cb * L)
        if lane_aligned:
            lane0 = pl.multiple_of(lane0, 128)
        cols = col2_ref[:, pl.ds(lane0, cb * L)]              # (48, cb*L)
        oc = jnp.dot(w2, cols, preferred_element_type=jnp.float32)
        oc = jnp.maximum(oc + b2_bc, 0.0)                     # (32, cb*L)
        for i in range(cb):                                   # static: cb <= 8
            o_ref[ci * cb + i] = oc[:, i * L:(i + 1) * L]
        return carry

    lax.fori_loop(0, n_chunk, _conv2_chunk, 0, unroll=False)
    for b in range(n_chunk * cb, b_tile):                     # static remainder
        cols = col2_ref[:, b * L:(b + 1) * L]
        oc = jnp.dot(w2, cols, preferred_element_type=jnp.float32)
        o_ref[b] = jnp.maximum(oc + b2_ref[...], 0.0)


def _choose_tiling(N, L):
    """Pick (b_tile, N_padded).

    ~800*L bytes of VMEM per batch in a tile: double-buffered input (2L) and
    output (32L) f32 blocks + xcol (8L) + col2 (48L) scratch + compiler temps.
    """
    per_batch = 800 * L
    cap = max(4, (20 * 1024 * 1024) // per_batch)   # ~20 MiB budget
    cap = min(cap, 256)
    if N <= 8:
        return N, N                                  # single step, full block
    steps = max(2, _cdiv(N, cap))                    # >= 2 steps (megacore)
    bt = _cdiv(N, steps)
    bt = ((bt + 3) // 4) * 4                         # keep (2*bt) % 8 == 0
    return bt, _cdiv(N, bt) * bt


def dummy_feature_extractor(x_ncl, w1, b1, w2, b2):
    """x_ncl: (N, 2, L) -> (N, 32, L), PyTorch NCL layout / semantics."""
    N, c_in, L = x_ncl.shape
    assert c_in == C_IN
    x_ncl = x_ncl.astype(jnp.float32)

    b_tile, n_pad = _choose_tiling(N, L)
    grid = n_pad // b_tile
    if n_pad != N:
        x_ncl = jnp.pad(x_ncl, ((0, n_pad - N), (0, 0), (0, 0)))
    x2d = x_ncl.reshape(n_pad * C_IN, L)             # free reshape, dense rows

    # Weight relayout (tiny, done once):
    #   conv1: (Cout,Cin,K) -> (Cout, K*Cin), col = k*2 + c, K-padded 6 -> 8
    #   conv2: (Cout,Cin,K) -> (Cout, K*Cin), col = k*16 + c
    w1_flat = jnp.transpose(w1.astype(jnp.float32), (0, 2, 1)).reshape(
        C_MID, C_IN * KSIZE)
    w1_pad = jnp.pad(w1_flat, ((0, 0), (0, _CONV1_K - C_IN * KSIZE)))
    w2_flat = jnp.transpose(w2.astype(jnp.float32), (0, 2, 1)).reshape(
        C_OUT, KSIZE * C_MID)
    b1_r = b1.reshape(C_MID, 1).astype(jnp.float32)
    b2_r = b2.reshape(C_OUT, 1).astype(jnp.float32)

    kernel = functools.partial(_fused_conv_kernel, b_tile=b_tile, L=L)

    flops = int(n_pad * L * (2 * C_MID * C_IN * KSIZE
                             + 2 * C_OUT * C_MID * KSIZE))
    bytes_accessed = int(4 * (n_pad * C_IN * L + n_pad * C_OUT * L
                              + w1_pad.size + w2_flat.size + C_MID + C_OUT))

    out = pl.pallas_call(
        kernel,
        out_shape=jax.ShapeDtypeStruct((n_pad, C_OUT, L), jnp.float32),
        grid_spec=pltpu.PrefetchScalarGridSpec(
            num_scalar_prefetch=0,
            grid=(grid,),
            in_specs=[
                pl.BlockSpec((C_IN * b_tile, L), lambda n: (n, 0)),
                pl.BlockSpec((C_MID, _CONV1_K), lambda n: (0, 0)),
                pl.BlockSpec((C_MID, 1), lambda n: (0, 0)),
                pl.BlockSpec((C_OUT, KSIZE * C_MID), lambda n: (0, 0)),
                pl.BlockSpec((C_OUT, 1), lambda n: (0, 0)),
            ],
            out_specs=pl.BlockSpec((b_tile, C_OUT, L), lambda n: (n, 0, 0)),
            scratch_shapes=[
                pltpu.VMEM((_CONV1_K, b_tile * L), jnp.float32),
                pltpu.VMEM((KSIZE * C_MID, b_tile * L), jnp.float32),
            ],
        ),
        compiler_params=pltpu.CompilerParams(
            dimension_semantics=("parallel",),
            vmem_limit_bytes=40 * 1024 * 1024),
        cost_estimate=pl.CostEstimate(flops=flops, transcendentals=0,
                                      bytes_accessed=bytes_accessed),
    )(x2d, w1_pad, b1_r, w2_flat, b2_r)

    return out[:N] if n_pad != N else out


def _conv1d_ref(x, w, b):
    """Pure-JAX reference conv1d (NCL, kernel=3, padding=1)."""
    N, c_in, L = x.shape
    xp = jnp.pad(x, ((0, 0), (0, 0), (1, 1)))
    out = jnp.zeros((N, w.shape[0], L), jnp.float32) + b[None, :, None]
    for k in range(KSIZE):
        out = out + jnp.einsum('ncl,oc->nol', xp[:, :, k:k + L], w[:, :, k])
    return out


def _reference(x, w1, b1, w2, b2):
    h = jnp.maximum(_conv1d_ref(x, w1, b1), 0.0)
    return jnp.maximum(_conv1d_ref(h, w2, b2), 0.0)


if __name__ == "__main__":
    key = jax.random.PRNGKey(0)
    k_x, k_w1, k_b1, k_w2, k_b2 = jax.random.split(key, 5)

    # Deterministic synthetic parameters (PyTorch Conv1d layout: (Cout, Cin, K)).
    w1 = 0.1 * jax.random.normal(k_w1, (C_MID, C_IN, KSIZE), dtype=jnp.float32)
    b1 = 0.1 * jax.random.normal(k_b1, (C_MID,), dtype=jnp.float32)
    w2 = 0.1 * jax.random.normal(k_w2, (C_OUT, C_MID, KSIZE), dtype=jnp.float32)
    b2 = 0.1 * jax.random.normal(k_b2, (C_OUT,), dtype=jnp.float32)

    # Primary small shape, plus one shape exercising the multi-step /
    # ragged-N / chunked-matmul paths.
    for (N, L) in ((2, 128), (23, 128)):
        x = jax.random.normal(k_x, (N, C_IN, L), dtype=jnp.float32)
        out = jax.block_until_ready(dummy_feature_extractor(x, w1, b1, w2, b2))
        ref = _reference(x, w1, b1, w2, b2)
        assert out.shape == (N, C_OUT, L), out.shape
        err = float(jnp.max(jnp.abs(out - ref)))
        assert err < 1e-4, err

    print("KERNEL_OK")
</pallas_src>

<mosaic_0001>
module attributes {stable_mosaic.version = 11 : i64} {
  func.func @_fused_conv_kernel(%arg0: i32, %arg1: memref<4x128xf32, #tpu.memory_space<vmem>>, %arg2: memref<16x8xf32, #tpu.memory_space<vmem>>, %arg3: memref<16x1xf32, #tpu.memory_space<vmem>>, %arg4: memref<32x48xf32, #tpu.memory_space<vmem>>, %arg5: memref<32x1xf32, #tpu.memory_space<vmem>>, %arg6: memref<2x32x128xf32, #tpu.memory_space<vmem>>, %arg7: memref<8x256xf32, #tpu.memory_space<vmem>>, %arg8: memref<48x256xf32, #tpu.memory_space<vmem>>) attributes {dimension_semantics = [#tpu.dimension_semantics<parallel>], iteration_bounds = array<i64: 1>, scalar_prefetch = 0 : i64, scratch_operands = 2 : i64, tpu.core_type = #tpu.core_type<tc>, window_params = [{transform_indices = @transform_0, window_bounds = array<i64: 4, 128>}, {pipeline_mode = #tpu.pipeline_mode<synchronous>, transform_indices = @transform_1, window_bounds = array<i64: 16, 8>}, {pipeline_mode = #tpu.pipeline_mode<synchronous>, transform_indices = @transform_2, window_bounds = array<i64: 16, 1>}, {pipeline_mode = #tpu.pipeline_mode<synchronous>, transform_indices = @transform_3, window_bounds = array<i64: 32, 48>}, {pipeline_mode = #tpu.pipeline_mode<synchronous>, transform_indices = @transform_4, window_bounds = array<i64: 32, 1>}, {transform_indices = @transform_5, window_bounds = array<i64: 2, 32, 128>}]} {
    %cst = arith.constant 0.000000e+00 : f32
    %0 = vector.broadcast %cst : f32 to vector<2x256xf32>
    %c6 = arith.constant 6 : index
    %c0 = arith.constant 0 : index
    %1 = vector.load %arg7[%c6, %c0] : memref<8x256xf32, #tpu.memory_space<vmem>>, vector<2x256xf32>
    tpu.vector_store %arg7[%c6, %c0], %0 {strides = array<i32>} : memref<8x256xf32, #tpu.memory_space<vmem>>, vector<2x256xf32>,
    %2 = tpu.iota {dimensions = array<i32: 1>} : vector<1x256xi32>
    %c127_i32 = arith.constant 127 : i32
    %3 = vector.broadcast %c127_i32 : i32 to vector<1x256xi32>
    %4 = arith.andi %2, %3 : vector<1x256xi32>
    %c1_i32 = arith.constant 1 : i32
    %5 = vector.broadcast %c1_i32 : i32 to vector<1x256xi32>
    %6 = arith.cmpi sge, %4, %5 : vector<1x256xi32>
    %c126_i32 = arith.constant 126 : i32
    %7 = vector.broadcast %c126_i32 : i32 to vector<1x256xi32>
    %8 = arith.cmpi sle, %4, %7 : vector<1x256xi32>
    %c0_0 = arith.constant 0 : index
    %c0_1 = arith.constant 0 : index
    %9 = vector.load %arg1[%c0_0, %c0_1] : memref<4x128xf32, #tpu.memory_space<vmem>>, vector<2x128xf32>
    %c2 = arith.constant 2 : index
    %c0_2 = arith.constant 0 : index
    %10 = vector.load %arg7[%c2, %c0_2] : memref<8x256xf32, #tpu.memory_space<vmem>>, vector<2x128xf32>
    tpu.vector_store %arg7[%c2, %c0_2], %9 {strides = array<i32>} : memref<8x256xf32, #tpu.memory_space<vmem>>, vector<2x128xf32>,
    %c2_3 = arith.constant 2 : index
    %c0_4 = arith.constant 0 : index
    %11 = vector.load %arg1[%c2_3, %c0_4] : memref<4x128xf32, #tpu.memory_space<vmem>>, vector<2x128xf32>
    %c2_5 = arith.constant 2 : index
    %c128 = arith.constant 128 : index
    %12 = vector.load %arg7[%c2_5, %c128] : memref<8x256xf32, #tpu.memory_space<vmem>>, vector<2x128xf32>
    tpu.vector_store %arg7[%c2_5, %c128], %11 {strides = array<i32>} : memref<8x256xf32, #tpu.memory_space<vmem>>, vector<2x128xf32>,
    %c2_6 = arith.constant 2 : index
    %c0_7 = arith.constant 0 : index
    %13 = vector.load %arg7[%c2_6, %c0_7] : memref<8x256xf32, #tpu.memory_space<vmem>>, vector<2x256xf32>
    %c1_i32_8 = arith.constant 1 : i32
    %14 = tpu.dynamic_rotate %13 by %c1_i32_8 dim 1 : vector<2x256xf32>, i32 -> vector<2x256xf32>
    %cst_9 = arith.constant 0.000000e+00 : f32
    %15 = vector.shape_cast %6 : vector<1x256xi1> to vector<1x256xi1>
    %16 = vector.broadcast %15 : vector<1x256xi1> to vector<2x256xi1>
    %17 = vector.broadcast %cst_9 : f32 to vector<2x256xf32>
    %18 = arith.select %16, %14, %17 : vector<2x256xi1>, vector<2x256xf32>
    %c0_10 = arith.constant 0 : index
    %c0_11 = arith.constant 0 : index
    %19 = vector.load %arg7[%c0_10, %c0_11] : memref<8x256xf32, #tpu.memory_space<vmem>>, vector<2x256xf32>
    tpu.vector_store %arg7[%c0_10, %c0_11], %18 {strides = array<i32>} : memref<8x256xf32, #tpu.memory_space<vmem>>, vector<2x256xf32>,
    %c255_i32 = arith.constant 255 : i32
    %20 = tpu.dynamic_rotate %13 by %c255_i32 dim 1 : vector<2x256xf32>, i32 -> vector<2x256xf32>
    %cst_12 = arith.constant 0.000000e+00 : f32
    %21 = vector.shape_cast %8 : vector<1x256xi1> to vector<1x256xi1>
    %22 = vector.broadcast %21 : vector<1x256xi1> to vector<2x256xi1>
    %23 = vector.broadcast %cst_12 : f32 to vector<2x256xf32>
    %24 = arith.select %22, %20, %23 : vector<2x256xi1>, vector<2x256xf32>
    %c4 = arith.constant 4 : index
    %c0_13 = arith.constant 0 : index
    %25 = vector.load %arg7[%c4, %c0_13] : memref<8x256xf32, #tpu.memory_space<vmem>>, vector<2x256xf32>
    tpu.vector_store %arg7[%c4, %c0_13], %24 {strides = array<i32>} : memref<8x256xf32, #tpu.memory_space<vmem>>, vector<2x256xf32>,
    %c0_14 = arith.constant 0 : index
    %c0_15 = arith.constant 0 : index
    %26 = vector.load %arg2[%c0_14, %c0_15] : memref<16x8xf32, #tpu.memory_space<vmem>>, vector<16x8xf32>
    %c0_16 = arith.constant 0 : index
    %c0_17 = arith.constant 0 : index
    %27 = vector.load %arg7[%c0_16, %c0_17] : memref<8x256xf32, #tpu.memory_space<vmem>>, vector<8x256xf32>
    %cst_18 = arith.constant dense<0.000000e+00> : vector<16x256xf32>
    %28 = tpu.matmul %26, %27, %cst_18 {dimension_numbers = #tpu.dot_dimension_numbers<[1], [0], [0], [1], [0, 0, 1, 1], [], []>} : vector<16x8xf32>, vector<8x256xf32>, vector<16x256xf32> -> vector<16x256xf32>
    %c0_19 = arith.constant 0 : index
    %c0_20 = arith.constant 0 : index
    %29 = vector.load %arg3[%c0_19, %c0_20] : memref<16x1xf32, #tpu.memory_space<vmem>>, vector<16x1xf32>
    %30 = vector.broadcast %29 : vector<16x1xf32> to vector<16x256xf32>
    %31 = arith.addf %28, %30 : vector<16x256xf32>
    %cst_21 = arith.constant 0.000000e+00 : f32
    %32 = vector.broadcast %cst_21 : f32 to vector<16x256xf32>
    %33 = arith.maximumf %31, %32 : vector<16x256xf32>
    %c16 = arith.constant 16 : index
    %c0_22 = arith.constant 0 : index
    %34 = vector.load %arg8[%c16, %c0_22] : memref<48x256xf32, #tpu.memory_space<vmem>>, vector<16x256xf32>
    tpu.vector_store %arg8[%c16, %c0_22], %33 {strides = array<i32>} : memref<48x256xf32, #tpu.memory_space<vmem>>, vector<16x256xf32>,
    %c16_23 = arith.constant 16 : index
    %c0_24 = arith.constant 0 : index
    %35 = vector.load %arg8[%c16_23, %c0_24] : memref<48x256xf32, #tpu.memory_space<vmem>>, vector<16x256xf32>
    %c1_i32_25 = arith.constant 1 : i32
    %36 = tpu.dynamic_rotate %35 by %c1_i32_25 dim 1 : vector<16x256xf32>, i32 -> vector<16x256xf32>
    %cst_26 = arith.constant 0.000000e+00 : f32
    %37 = vector.shape_cast %6 : vector<1x256xi1> to vector<1x256xi1>
    %38 = vector.broadcast %37 : vector<1x256xi1> to vector<16x256xi1>
    %39 = vector.broadcast %cst_26 : f32 to vector<16x256xf32>
    %40 = arith.select %38, %36, %39 : vector<16x256xi1>, vector<16x256xf32>
    %c0_27 = arith.constant 0 : index
    %c0_28 = arith.constant 0 : index
    %41 = vector.load %arg8[%c0_27, %c0_28] : memref<48x256xf32, #tpu.memory_space<vmem>>, vector<16x256xf32>
    tpu.vector_store %arg8[%c0_27, %c0_28], %40 {strides = array<i32>} : memref<48x256xf32, #tpu.memory_space<vmem>>, vector<16x256xf32>,
    %c255_i32_29 = arith.constant 255 : i32
    %42 = tpu.dynamic_rotate %35 by %c255_i32_29 dim 1 : vector<16x256xf32>, i32 -> vector<16x256xf32>
    %cst_30 = arith.constant 0.000000e+00 : f32
    %43 = vector.shape_cast %8 : vector<1x256xi1> to vector<1x256xi1>
    %44 = vector.broadcast %43 : vector<1x256xi1> to vector<16x256xi1>
    %45 = vector.broadcast %cst_30 : f32 to vector<16x256xf32>
    %46 = arith.select %44, %42, %45 : vector<16x256xi1>, vector<16x256xf32>
    %c32 = arith.constant 32 : index
    %c0_31 = arith.constant 0 : index
    %47 = vector.load %arg8[%c32, %c0_31] : memref<48x256xf32, #tpu.memory_space<vmem>>, vector<16x256xf32>
    tpu.vector_store %arg8[%c32, %c0_31], %46 {strides = array<i32>} : memref<48x256xf32, #tpu.memory_space<vmem>>, vector<16x256xf32>,
    %c0_32 = arith.constant 0 : index
    %c0_33 = arith.constant 0 : index
    %48 = vector.load %arg4[%c0_32, %c0_33] : memref<32x48xf32, #tpu.memory_space<vmem>>, vector<32x48xf32>
    %c0_34 = arith.constant 0 : index
    %c0_35 = arith.constant 0 : index
    %49 = vector.load %arg5[%c0_34, %c0_35] : memref<32x1xf32, #tpu.memory_space<vmem>>, vector<32x1xf32>
    %50 = vector.shape_cast %49 : vector<32x1xf32> to vector<32x1xf32>
    %51 = vector.broadcast %50 : vector<32x1xf32> to vector<32x256xf32>
    %c0_i32 = arith.constant 0 : i32
    %c256_i32 = arith.constant 256 : i32
    %52 = arith.muli %c0_i32, %c256_i32 : i32
    %53 = tpu.assume_multiple %52, 128 : i32
    %c0_36 = arith.constant 0 : index
    %54 = arith.index_cast %53 : i32 to index
    %55 = vector.load %arg8[%c0_36, %54] : memref<48x256xf32, #tpu.memory_space<vmem>>, vector<48x256xf32>
    %cst_37 = arith.constant dense<0.000000e+00> : vector<32x256xf32>
    %56 = tpu.matmul %48, %55, %cst_37 {dimension_numbers = #tpu.dot_dimension_numbers<[1], [0], [0], [1], [0, 0, 1, 1], [], []>} : vector<32x48xf32>, vector<48x256xf32>, vector<32x256xf32> -> vector<32x256xf32>
    %57 = arith.addf %56, %51 : vector<32x256xf32>
    %cst_38 = arith.constant 0.000000e+00 : f32
    %58 = vector.broadcast %cst_38 : f32 to vector<32x256xf32>
    %59 = arith.maximumf %57, %58 : vector<32x256xf32>
    %60 = vector.extract_strided_slice %59 {offsets = [0, 0], sizes = [32, 128], strides = [1, 1]} : vector<32x256xf32> to vector<32x128xf32>
    %c2_i32 = arith.constant 2 : i32
    %61 = arith.muli %c0_i32, %c2_i32 : i32
    %c0_i32_39 = arith.constant 0 : i32
    %62 = arith.addi %61, %c0_i32_39 : i32
    %63 = arith.index_cast %62 : i32 to index
    %c0_40 = arith.constant 0 : index
    %c0_41 = arith.constant 0 : index
    %64 = vector.load %arg6[%63, %c0_40, %c0_41] : memref<2x32x128xf32, #tpu.memory_space<vmem>>, vector<1x32x128xf32>
    %65 = vector.shape_cast %64 : vector<1x32x128xf32> to vector<32x128xf32>
    %66 = vector.shape_cast %60 : vector<32x128xf32> to vector<1x32x128xf32>
    tpu.vector_store %arg6[%63, %c0_40, %c0_41], %66 {strides = array<i32>} : memref<2x32x128xf32, #tpu.memory_space<vmem>>, vector<1x32x128xf32>,
    %67 = vector.extract_strided_slice %59 {offsets = [0, 128], sizes = [32, 128], strides = [1, 1]} : vector<32x256xf32> to vector<32x128xf32>
    %c2_i32_42 = arith.constant 2 : i32
    %68 = arith.muli %c0_i32, %c2_i32_42 : i32
    %c1_i32_43 = arith.constant 1 : i32
    %69 = arith.addi %68, %c1_i32_43 : i32
    %70 = arith.index_cast %69 : i32 to index
    %c0_44 = arith.constant 0 : index
    %c0_45 = arith.constant 0 : index
    %71 = vector.load %arg6[%70, %c0_44, %c0_45] : memref<2x32x128xf32, #tpu.memory_space<vmem>>, vector<1x32x128xf32>
    %72 = vector.shape_cast %71 : vector<1x32x128xf32> to vector<32x128xf32>
    %73 = vector.shape_cast %67 : vector<32x128xf32> to vector<1x32x128xf32>
    tpu.vector_store %arg6[%70, %c0_44, %c0_45], %73 {strides = array<i32>} : memref<2x32x128xf32, #tpu.memory_space<vmem>>, vector<1x32x128xf32>,
    %c1_i32_46 = arith.constant 1 : i32
    return
  }
  func.func @transform_0(%arg0: i32) -> (i32, i32) {
    %c0_i32 = arith.constant 0 : i32
    %c0_i32_0 = arith.constant 0 : i32
    return %arg0, %c0_i32 : i32, i32
  }
  func.func @transform_1(%arg0: i32) -> (i32, i32) {
    %c0_i32 = arith.constant 0 : i32
    %c0_i32_0 = arith.constant 0 : i32
    %c0_i32_1 = arith.constant 0 : i32
    return %c0_i32, %c0_i32_0 : i32, i32
  }
  func.func @transform_2(%arg0: i32) -> (i32, i32) {
    %c0_i32 = arith.constant 0 : i32
    %c0_i32_0 = arith.constant 0 : i32
    %c0_i32_1 = arith.constant 0 : i32
    return %c0_i32, %c0_i32_0 : i32, i32
  }
  func.func @transform_3(%arg0: i32) -> (i32, i32) {
    %c0_i32 = arith.constant 0 : i32
    %c0_i32_0 = arith.constant 0 : i32
    %c0_i32_1 = arith.constant 0 : i32
    return %c0_i32, %c0_i32_0 : i32, i32
  }
  func.func @transform_4(%arg0: i32) -> (i32, i32) {
    %c0_i32 = arith.constant 0 : i32
    %c0_i32_0 = arith.constant 0 : i32
    %c0_i32_1 = arith.constant 0 : i32
    return %c0_i32, %c0_i32_0 : i32, i32
  }
  func.func @transform_5(%arg0: i32) -> (i32, i32, i32) {
    %c0_i32 = arith.constant 0 : i32
    %c0_i32_0 = arith.constant 0 : i32
    %c0_i32_1 = arith.constant 0 : i32
    return %arg0, %c0_i32, %c0_i32_0 : i32, i32, i32
  }
}

</mosaic_0001>

<bundles_post_ra>
// kernel: tpu_custom_call.1
= control target key start
LH: loop header
LB: loop body
LE: loop exit
PB: predicated region body
PF: predicated region fallthrough
CT: control target
= control target key end

     0   :  { %s651_s0 = inlined_call_operand.vmem [shape: f32[4,128], index: 0, kind: input, shape index: {}]   ;;  %s652_s1 = inlined_call_operand.vmem [shape: f32[16,8], index: 1, kind: input, shape index: {}]   ;;  %s653_s2 = inlined_call_operand.vmem [shape: f32[16,1], index: 2, kind: input, shape index: {}]   ;;  %s654_s3 = inlined_call_operand.vmem [shape: f32[32,48], index: 3, kind: input, shape index: {}]   ;;  %s655_s4 = inlined_call_operand.vmem [shape: f32[32,1], index: 4, kind: input, shape index: {}]   ;;  %s656_s5 = inlined_call_operand.hbm [shape: f32[2,32,128], index: 5, kind: output, shape index: {}]  }
   0x1   :  { %v32_v0 = vld [vmem:[%s651_s0] sm:$0x3]  ;;  %v37_v1 = vld [vmem:[%s651_s0 + $0x2] sm:$0x3] }
   0x2   :  { %v34_v2 = vrot.slane %v32_v0, 6  ;;  %v39_v3 = vrot.slane %v37_v1, 6 }
   0x3   :  { %10 = vsyncpa [#allocation5], 0  ;;  %v470_v4 = vmov 0.0   ;;  %s471_s22 = smov 1   ;;  %s472_s0 = smov 127   ;;  %v90_v9 = vld [vmem:[%s653_s2] sm:$0xff]  ;;  %v23_v12 = vlaneseq }
   0x4   :  { %36 = vst [vmem:[#allocation2] sm:$0xc] %v34_v2  ;;  %41 = vst [vmem:[#allocation2 + $0x8] sm:$0xc] %v39_v3  ;;  %173 = vmatprep.mubr.f32.mxu0 %v470_v4  ;;  %361 = vmatprep.mubr.f32.mxu1 %v470_v4  ;;  %v91_v10 = vld [vmem:[%s653_s2 + $0x8] sm:$0xff]  ;;  %v473_v11 = vmov 0  }
   0x5   :  { %22 = vst [vmem:[#allocation2 + $0x8] sm:$0xc0] %v470_v4  ;;  %21 = vst [vmem:[#allocation2] sm:$0xc0] %v470_v4  ;;  %447 = vset.pattern.permute.xlu1 %v473_v11  ;;  %446 = vset.pattern.permute.xlu0 %v473_v11  ;;  %v527_v13 = vand.u32 127, %v23_v12  ;;  %v86_v34 = vld [vmem:[%s652_s1] sm:$0xff] }
   0x6   :  { %vm102_vm6 = vcmask 64512   ;;  %v87_v35 = vld [vmem:[%s652_s1 + $0x8] sm:$0xff]  ;;  %v242_v50 = vld [vmem:[%s655_s4] sm:$0xff]  ;;  %v244_v52 = vld [vmem:[%s655_s4 + $0x10] sm:$0xff]  ;;  %vm278_vm7 = vcmask 392192  }
   0x7   :  { %v25_v14 = vadd.s32 128, %v527_v13  ;;  %vm54_vm0 = vcmp.lt.s32.totalorder %v527_v13, 1  ;;  %vm69_vm1 = vcmp.lt.s32.totalorder %v527_v13, 127  ;;  %vm28_vm2 = vcmp.ge.s32.totalorder %v527_v13, 1  ;;  %v243_v51 = vld [vmem:[%s655_s4 + $0x8] sm:$0xff]  ;;  %v245_v53 = vld [vmem:[%s655_s4 + $0x18] sm:$0xff] }
   0x8   :  { %vm30_vm4 = vcmp.le.s32.totalorder %v527_v13, 126 }
   0x9   :  { %v27_v15 = vand.u32 127, %v25_v14 }
   0xb   :  { %v42_v5 = vld [vmem:[#allocation2] sm:$0xc]  ;;  %v43_v6 = vld [vmem:[#allocation2 + $0x8] sm:$0xc]  ;;  %vm533_vm3 = vcmp.ge.s32.totalorder %v27_v15, 1  ;;  %vm538_vm5 = vcmp.le.s32.totalorder %v27_v15, 126 }
   0xc   :  { %v46_v7 = vrot.slane %v42_v5, 2  ;;  %v47_v8 = vrot.slane %v43_v6, 2 }
   0xe   :  { %50 = vrot.lane.b32.xlu1 %v46_v7, %s471_s22  ;;  %65 = vrot.lane.b32.xlu0 %v46_v7, %s472_s0  ;;  %v238_v7 = vld [vmem:[%s654_s3] sm:$0xff] }
  0x12   :  { %52 = vrot.lane.b32.xlu1 %v47_v8, %s471_s22  ;;  %67 = vrot.lane.b32.xlu0 %v47_v8, %s472_s0  ;;  %v239_v8 = vld [vmem:[%s654_s3 + $0x8] sm:$0xff] }
  0x16   :  { %94 = vperm.xlu1 %447, %v90_v9   ;;  %99 = vperm.xlu0 %446, %v91_v10   ;;  %v240_v9 = vld [vmem:[%s654_s3 + $0x10] sm:$0xff]  ;;  %v241_v10 = vld [vmem:[%s654_s3 + $0x18] sm:$0xff]  ;;  %s474_s3 = smov [#allocation4]  }
  0x17   :  { %s402_s19 = sshll.u32 %s474_s3, 4  ;;  %s403_s19 = int_to_ptr.vmem [resolvable:$true] %s402_s19 }
  0x18   :  { %s448_s20 = scalar_lea.vmem %s403_s19, 1024  ;;  %p453_p1 = scmp.lt.s32.totalorder %s403_s19, %s403_s19 }
  0x19   :  { %p449_p0 = scmp.ne.s32.totalorder %s403_s19, %s448_s20  ;;  %p454_p2 = scmp.lt.s32.totalorder %s448_s20, %s448_s20 }
  0x1b   :  { %p455_p3 = por %p454_p2, %p453_p1 }
  0x1d   :  { %p456_p4 = pnand %p455_p3, %p449_p0 }
  0x80   :  { %v51_v16 = vpop.permute.xlu1 %50  ;;  %v66_v17 = vpop.permute.xlu0 %65 }
  0x84   :  { %v53_v20 = vpop.permute.xlu1 %52  ;;  %v68_v21 = vpop.permute.xlu0 %67 }
  0x85   :  { %v55_v22 = vsel %vm54_vm0, %v51_v16, %v53_v20  ;;  %v56_v23 = vsel %vm54_vm0, %v53_v20, %v51_v16  ;;  %v70_v24 = vsel %vm69_vm1, %v66_v17, %v68_v21  ;;  %v71_v25 = vsel %vm69_vm1, %v68_v21, %v66_v17 }
  0x86   :  { %v61_v26 = vsel %vm28_vm2, %v56_v23, 0.0  ;;  %v62_v27 = vsel %vm533_vm3, %v55_v22, 0.0  ;;  %v76_v28 = vsel %vm30_vm4, %v70_v24, 0.0  ;;  %v77_v29 = vsel %vm538_vm5, %v71_v25, 0.0 }
  0x87   :  { %63 = vst [vmem:[#allocation2] sm:$0x3] %v61_v26  ;;  %64 = vst [vmem:[#allocation2 + $0x8] sm:$0x3] %v62_v27  ;;  %v80_v30 = vrot.slane %v76_v28, 4  ;;  %v81_v31 = vrot.slane %v77_v29, 4 }
  0x89   :  { %84 = vst [vmem:[#allocation2] sm:$0x30] %v80_v30  ;;  %85 = vst [vmem:[#allocation2 + $0x8] sm:$0x30] %v81_v31 }
  0x90   :  { %v89_v32 = vld [vmem:[#allocation2 + $0x8] sm:$0xff]  ;;  %v88_v33 = vld [vmem:[#allocation2] sm:$0xff] }
  0x91   :  { %139 = vmatprep.subr.mxu0 %v89_v32  ;;  %v100_v38 = vpop.permute.xlu0 %99  ;;  %v95_v39 = vpop.permute.xlu1 %94 }
  0x92   :  { %140 = vmatpush1.msra.mxu0 %v88_v33 }
  0x93   :  { %413 = vmatmul.mubr.msk.f32.vlgmr.msra.gmra.mxu0 %vm102_vm6, %v86_v34 }
  0x94   :  { %179 = vmatprep.mubr.f32.mxu0 %v470_v4 }
  0x97   :  { %414 = vmatmul.mubr.msk.f32.gmra.mxu0 %vm102_vm6, %v87_v35 }
  0x98   :  { %355 = vmatprep.mubr.f32.mxu0 %v470_v4 }
 0x153   :  { %v175_v36 = vpop.f32.mrf.mxu0 }
 0x154   :  { %v176_v43 = vadd.f32 %v175_v36, %v95_v39 }
 0x155   :  { %v177_v37 = vpop.f32.mrf.mxu0 }
 0x156   :  { %v178_v46 = vadd.f32 %v177_v37, %v95_v39  ;;  %v186_v48 = vmax.f32 %v176_v43, 0.0 }
 0x157   :  { %v181_v40 = vpop.f32.mrf.mxu0 }
 0x158   :  { %v182_v41 = vadd.f32 %v181_v40, %v100_v38  ;;  %v187_v49 = vmax.f32 %v178_v46, 0.0 }
 0x159   :  { %v183_v42 = vpop.f32.mrf.mxu0 }
 0x15a   :  { %v188_v44 = vmax.f32 %v182_v41, 0.0  ;;  %v184_v45 = vadd.f32 %v183_v42, %v100_v38 }
 0x15c   :  { %v189_v47 = vmax.f32 %v184_v45, 0.0  ;;  %220 = vrot.lane.b32.xlu1 %v188_v44, %s472_s0 }
 0x15e   :  { %224 = vrot.lane.b32.xlu0 %v189_v47, %s472_s0 }
 0x160   :  { %218 = vrot.lane.b32.xlu1 %v186_v48, %s472_s0 }
 0x162   :  { %222 = vrot.lane.b32.xlu0 %v187_v49, %s472_s0 }
 0x164   :  { %200 = vrot.lane.b32.xlu1 %v188_v44, %s471_s22 }
 0x166   :  { %204 = vrot.lane.b32.xlu0 %v189_v47, %s471_s22 }
 0x168   :  { %198 = vrot.lane.b32.xlu1 %v186_v48, %s471_s22 }
 0x16a   :  { %202 = vrot.lane.b32.xlu0 %v187_v49, %s471_s22 }
 0x16c   :  { %248 = vperm.xlu1 %447, %v242_v50  }
 0x16e   :  { %253 = vperm.xlu0 %446, %v243_v51  }
 0x170   :  { %258 = vperm.xlu1 %447, %v244_v52  }
 0x172   :  { %263 = vperm.xlu0 %446, %v245_v53  }
 0x1ce   :  { %v221_v54 = vpop.permute.xlu1 %220 }
 0x1d0   :  { %v225_v55 = vpop.permute.xlu0 %224 }
 0x1d1   :  { %v227_v56 = vsel %vm69_vm1, %v221_v54, %v225_v55  ;;  %v229_v57 = vsel %vm69_vm1, %v225_v55, %v221_v54 }
 0x1d2   :  { %419 = vmatprep.subr.msk.mxu0 %vm538_vm5, %v229_v57  ;;  %427 = vmatprep.subr.msk.mxu1 %vm538_vm5, %v229_v57  ;;  %v219_v58 = vpop.permute.xlu1 %218 }
 0x1d3   :  { %420 = vmatpush1.msk.msra.mxu0 %vm30_vm4, %v227_v56  ;;  %433 = vmatpush1.msk.msra.mxu1 %vm30_vm4, %v227_v56 }
 0x1d4   :  { %v223_v59 = vpop.permute.xlu0 %222 }
 0x1d5   :  { %v226_v60 = vsel %vm69_vm1, %v219_v58, %v223_v59  ;;  %v228_v61 = vsel %vm69_vm1, %v223_v59, %v219_v58 }
 0x1d6   :  { %421 = vmatprep.subr.msk.mxu0 %vm538_vm5, %v228_v61  ;;  %428 = vmatprep.subr.msk.mxu1 %vm538_vm5, %v228_v61  ;;  %v201_v62 = vpop.permute.xlu1 %200 }
 0x1d7   :  { %422 = vmatpush1.msk.msra.mxu0 %vm30_vm4, %v226_v60  ;;  %434 = vmatpush1.msk.msra.mxu1 %vm30_vm4, %v226_v60 }
 0x1d8   :  { %v205_v63 = vpop.permute.xlu0 %204  ;;  %315 = vmatprep.subr.mxu0 %v189_v47  ;;  %429 = vmatprep.subr.mxu1 %v189_v47 }
 0x1d9   :  { %316 = vmatpush1.msra.mxu0 %v188_v44  ;;  %435 = vmatpush1.msra.mxu1 %v188_v44  ;;  %v207_v0 = vsel %vm54_vm0, %v201_v62, %v205_v63  ;;  %v209_v1 = vsel %vm54_vm0, %v205_v63, %v201_v62 }
 0x1da   :  { %317 = vmatprep.subr.mxu0 %v187_v49  ;;  %430 = vmatprep.subr.mxu1 %v187_v49  ;;  %v199_v2 = vpop.permute.xlu1 %198 }
 0x1db   :  { %318 = vmatpush1.msra.mxu0 %v186_v48  ;;  %436 = vmatpush1.msra.mxu1 %v186_v48 }
 0x1dc   :  { %v203_v3 = vpop.permute.xlu0 %202  ;;  %423 = vmatprep.subr.msk.mxu0 %vm533_vm3, %v207_v0  ;;  %431 = vmatprep.subr.msk.mxu1 %vm533_vm3, %v207_v0 }
 0x1dd   :  { %v206_v5 = vsel %vm54_vm0, %v199_v2, %v203_v3  ;;  %v208_v6 = vsel %vm54_vm0, %v203_v3, %v199_v2  ;;  %424 = vmatpush1.msk.msra.mxu0 %vm28_vm2, %v209_v1  ;;  %437 = vmatpush1.msk.msra.mxu1 %vm28_vm2, %v209_v1 }
 0x1de   :  { %425 = vmatprep.subr.msk.mxu0 %vm533_vm3, %v206_v5  ;;  %432 = vmatprep.subr.msk.mxu1 %vm533_vm3, %v206_v5 }
 0x1df   :  { %426 = vmatpush1.msk.msra.mxu0 %vm28_vm2, %v208_v6  ;;  %438 = vmatpush1.msk.msra.mxu1 %vm28_vm2, %v208_v6 }
 0x1e0   :  { %415 = vmatmul.mubr.msk.f32.vlgmr.msra.gmra.mxu0 %vm278_vm7, %v238_v7  ;;  %416 = vmatmul.mubr.msk.f32.vlgmr.msra.gmra.mxu1 %vm278_vm7, %v239_v8 }
 0x1e1   :  { %367 = vmatprep.mubr.f32.mxu1 %v470_v4 }
 0x1e4   :  { %417 = vmatmul.mubr.msk.f32.gmra.mxu1 %vm278_vm7, %v240_v9 }
 0x1e5   :  { %373 = vmatprep.mubr.f32.mxu1 %v470_v4 }
 0x1e7   :  { %v249_v11 = vpop.permute.xlu1 %248 }
 0x1e8   :  { %418 = vmatmul.mubr.msk.f32.gmra.mxu1 %vm278_vm7, %v241_v10 }
 0x1e9   :  { %v254_v12 = vpop.permute.xlu0 %253 }
 0x1eb   :  { %v259_v23 = vpop.permute.xlu1 %258 }
 0x1ed   :  { %v264_v30 = vpop.permute.xlu0 %263 }
 0x2a0   :  { %v357_v13 = vpop.f32.mrf.mxu0  ;;  %v363_v14 = vpop.f32.mrf.mxu1 }
 0x2a1   :  { %v358_v15 = vadd.f32 %v357_v13, %v249_v11  ;;  %v364_v16 = vadd.f32 %v363_v14, %v254_v12 }
 0x2a2   :  { %v359_v17 = vpop.f32.mrf.mxu0  ;;  %v365_v18 = vpop.f32.mrf.mxu1 }
 0x2a3   :  { %v380_v19 = vmax.f32 %v358_v15, 0.0  ;;  %v382_v20 = vmax.f32 %v364_v16, 0.0  ;;  %v360_v21 = vadd.f32 %v359_v17, %v249_v11  ;;  %v366_v22 = vadd.f32 %v365_v18, %v254_v12 }
 0x2a4   :  { %v369_v24 = vpop.f32.mrf.mxu1 }
 0x2a5   :  { %388 = vst [vmem:[#allocation4] sm:$0xff] %v380_v19  ;;  %389 = vst [vmem:[#allocation4 + $0x8] sm:$0xff] %v382_v20  ;;  %v381_v4 = vmax.f32 %v360_v21, 0.0  ;;  %v383_v25 = vmax.f32 %v366_v22, 0.0  ;;  %v370_v26 = vadd.f32 %v369_v24, %v259_v23 }
 0x2a6   :  { %v371_v27 = vpop.f32.mrf.mxu1 }
 0x2a7   :  { %393 = vst [vmem:[#allocation4 + $0x20] sm:$0xff] %v381_v4  ;;  %394 = vst [vmem:[#allocation4 + $0x28] sm:$0xff] %v383_v25  ;;  %v384_v28 = vmax.f32 %v370_v26, 0.0  ;;  %v372_v29 = vadd.f32 %v371_v27, %v259_v23 }
 0x2a8   :  { %v375_v31 = vpop.f32.mrf.mxu1 }
 0x2a9   :  { %390 = vst [vmem:[#allocation4 + $0x10] sm:$0xff] %v384_v28  ;;  %v385_v32 = vmax.f32 %v372_v29, 0.0  ;;  %v376_v33 = vadd.f32 %v375_v31, %v264_v30 }
 0x2aa   :  { %v377_v34 = vpop.f32.mrf.mxu1 }
 0x2ab   :  { %395 = vst [vmem:[#allocation4 + $0x30] sm:$0xff] %v385_v32  ;;  %v386_v35 = vmax.f32 %v376_v33, 0.0  ;;  %v378_v36 = vadd.f32 %v377_v34, %v264_v30 }
 0x2ad   :  { %391 = vst [vmem:[#allocation4 + $0x18] sm:$0xff] %v386_v35  ;;  %v387_v37 = vmax.f32 %v378_v36, 0.0 }
 0x2af   :  { %396 = vst [vmem:[#allocation4 + $0x38] sm:$0xff] %v387_v37 }
 0x2b0   :  { %459 = shalt.err (!%p456_p4)
}
 0x2b1   :  { %s475_s21 = smov 128   ;;  %s476_s22 = smov 8  }
 0x2b2   :  { %408 = dma.vmem_to_hbm [thread:$0]  %s403_s19, 1024, %s656_s5, [#allocation5], %s475_s21, %s475_s21, %s476_s22  }
 0x2b3   :  { %468 = dma.done.wait [#allocation5], 1024  }
 0x2b4   :  { %469 = vsyncadd [#allocation5], 4294966272 }
 0x2b5   :  { %412 = vsyncpa [#allocation5], 1 }

</bundles_post_ra>
